<compile_context>
chip_gen: v5e
topology: v5e:2x2
jax: 0.10.0
libtpu: 0.0.40
codegen_flags: <defaults>
</compile_context>

<pallas_src>
import jax
import jax.numpy as jnp
from jax.experimental import pallas as pl
from jax.experimental.pallas import tpu as pltpu


def _lstm_kernel(x_ref, wih_ref, whh_ref, b_ref, h_out_ref):
    """Whole-sequence single-layer LSTM; writes only the final hidden state.

    x_ref    : (B, T, D)  batch-first inputs (whole sequence, VMEM resident)
    wih_ref  : (D, 4H)    input-to-hidden weights, transposed, gates [i,f,o,g]
    whh_ref  : (H, 4H)    hidden-to-hidden weights, transposed, gates [i,f,o,g]
    b_ref    : (1, 4H)    combined bias (b_ih + b_hh), gates [i,f,o,g], f32
    h_out_ref: (B, H)     final hidden state h_T
    """
    B, T, D = x_ref.shape
    H4 = whh_ref.shape[-1]
    H = H4 // 4
    mm_dtype = whh_ref.dtype            # MXU operand dtype (f32 exact / bf16 fast)

    # Hoisted out of the recurrence: weight load + bias (broadcast added once).
    whh = whh_ref[...]                                           # (H, 4H)
    bias = b_ref[...].astype(jnp.float32)                        # (1, 4H)

    # ---- Phase 0 (off the serial critical path): input projection for all
    # timesteps as one MXU matmul, laid out TIME-MAJOR so each step's slab is
    # a static contiguous sublane slice of a register value.
    if T > 0:
        x_tm = jnp.transpose(x_ref[...], (1, 0, 2)).reshape(T * B, D)
        gx = jnp.dot(x_tm.astype(mm_dtype), wih_ref[...],
                     preferred_element_type=jnp.float32) + bias  # (T*B, 4H) f32
    else:
        gx = jnp.zeros((0, H4), jnp.float32)   # T==0: nn.LSTM would error; we return zeros

    # ---- Serial recurrence: only h_prev @ Whh^T + fused gate math remain.
    # TODO(synk): holding Whh in MXU weight-staging registers across the loop
    # (pltpu.matmul_push_rhs / matmul_acc_lhs / matmul_pop) would avoid the
    # per-step RHS re-push; kept as jnp.dot for lowering robustness.
    h = jnp.zeros((B, H), jnp.float32)
    c = jnp.zeros((B, H), jnp.float32)
    for t in range(T):                   # static, fully unrolled (small T)
        gates = gx[t * B:(t + 1) * B, :] + jnp.dot(
            h.astype(mm_dtype), whh, preferred_element_type=jnp.float32)
        sig = jax.nn.sigmoid(gates[:, :3 * H])      # one EUP slab: [ i | f | o ]
        g_g = jnp.tanh(gates[:, 3 * H:])            # one EUP slab: [ g ]
        i_g = sig[:, 0 * H:1 * H]
        f_g = sig[:, 1 * H:2 * H]
        o_g = sig[:, 2 * H:3 * H]
        c = f_g * c + i_g * g_g
        h = o_g * jnp.tanh(c)

    h_out_ref[...] = h.astype(h_out_ref.dtype)


def _reorder_gates_ifgo_to_ifog(m):
    """PyTorch packs LSTM gates as [i, f, g, o]; reorder to [i, f, o, g]."""
    i, f, g, o = jnp.split(m, 4, axis=-1)
    return jnp.concatenate([i, f, o, g], axis=-1)


def prepare_lstm_params(w_ih, w_hh, b_ih, b_hh, matmul_dtype=jnp.float32):
    """One-time parameter prep (run at parameter-load time, NOT per forward).

    PyTorch layout in : w_ih (4H, D), w_hh (4H, H), biases (4H,), gates [i,f,g,o].
    Kernel layout out : Wih^T (D, 4H), Whh^T (H, 4H), bias (1, 4H), gates [i,f,o,g].
    matmul_dtype sets the MXU operand dtype (f32 or bf16); accumulation and
    gate math stay f32 inside the kernel either way.
    """
    wih_t = _reorder_gates_ifgo_to_ifog(jnp.transpose(w_ih, (1, 0))).astype(matmul_dtype)
    whh_t = _reorder_gates_ifgo_to_ifog(jnp.transpose(w_hh, (1, 0))).astype(matmul_dtype)
    bias = _reorder_gates_ifgo_to_ifog((b_ih + b_hh).reshape(1, -1)).astype(jnp.float32)
    return wih_t, whh_t, bias


def time_series_encoder_forward(x, wih_t, whh_t, bias):
    """Pallas equivalent of TimeSeriesEncoder.forward: returns h_n.squeeze(0).

    x                 : (B, T, D) batch-first input
    wih_t, whh_t, bias: outputs of prepare_lstm_params
    returns (B, H)
    """
    B, T, D = x.shape
    H4 = whh_t.shape[-1]
    H = H4 // 4

    # Explicit VMEM budget: compile-time decision with generous headroom over
    # the (tiny) working set; well under v7x's 64 MiB total / 32 MiB scoped.
    def _nbytes(a):
        return int(a.size) * a.dtype.itemsize
    working = (_nbytes(x) + _nbytes(wih_t) + _nbytes(whh_t) + _nbytes(bias)
               + B * H * x.dtype.itemsize)
    vmem_limit = int(min(32 * 1024 * 1024, max(4 * 1024 * 1024, 4 * working)))

    return pl.pallas_call(
        _lstm_kernel,
        out_shape=jax.ShapeDtypeStruct((B, H), x.dtype),
        in_specs=[
            pl.BlockSpec((B, T, D), lambda: (0, 0, 0)),   # whole sequence, batch-first
            pl.BlockSpec((D, H4), lambda: (0, 0)),        # Wih^T, gates [i,f,o,g]
            pl.BlockSpec((H, H4), lambda: (0, 0)),        # Whh^T, gates [i,f,o,g]
            pl.BlockSpec((1, H4), lambda: (0, 0)),        # combined bias
        ],
        out_specs=pl.BlockSpec((B, H), lambda: (0, 0)),
        compiler_params=pltpu.CompilerParams(vmem_limit_bytes=vmem_limit),
    )(x, wih_t, whh_t, bias)


def _lstm_reference(x, w_ih, w_hh, b_ih, b_hh):
    """Pure-JAX reference of a single-layer PyTorch LSTM final hidden state."""
    B, T, D = x.shape
    H = w_hh.shape[1]

    def step(carry, x_t):
        h, c = carry
        gates = x_t @ w_ih.T + h @ w_hh.T + b_ih + b_hh
        i = jax.nn.sigmoid(gates[:, 0 * H:1 * H])
        f = jax.nn.sigmoid(gates[:, 1 * H:2 * H])
        g = jnp.tanh(gates[:, 2 * H:3 * H])
        o = jax.nn.sigmoid(gates[:, 3 * H:4 * H])
        c = f * c + i * g
        h = o * jnp.tanh(c)
        return (h, c), None

    h0 = jnp.zeros((B, H), x.dtype)
    c0 = jnp.zeros((B, H), x.dtype)
    (h_n, _), _ = jax.lax.scan(step, (h0, c0), jnp.transpose(x, (1, 0, 2)))
    return h_n


if __name__ == "__main__":
    # Small shapes consistent with the module: batch=2, seq=8, input_dim=4, hidden=32.
    B, T, D, H = 2, 8, 4, 32

    key = jax.random.PRNGKey(0)
    kx, k1, k2, k3, k4 = jax.random.split(key, 5)

    x = jax.random.normal(kx, (B, T, D), dtype=jnp.float32)

    # Deterministic parameter init (PyTorch LSTM uses U(-1/sqrt(H), 1/sqrt(H))).
    bound = 1.0 / (H ** 0.5)
    w_ih = jax.random.uniform(k1, (4 * H, D), minval=-bound, maxval=bound, dtype=jnp.float32)
    w_hh = jax.random.uniform(k2, (4 * H, H), minval=-bound, maxval=bound, dtype=jnp.float32)
    b_ih = jax.random.uniform(k3, (4 * H,), minval=-bound, maxval=bound, dtype=jnp.float32)
    b_hh = jax.random.uniform(k4, (4 * H,), minval=-bound, maxval=bound, dtype=jnp.float32)

    ref = _lstm_reference(x, w_ih, w_hh, b_ih, b_hh)
    fwd = jax.jit(time_series_encoder_forward)

    # --- f32 MXU operands: numerically faithful to the PyTorch f32 LSTM.
    params_f32 = prepare_lstm_params(w_ih, w_hh, b_ih, b_hh, matmul_dtype=jnp.float32)
    h_f32 = jax.block_until_ready(fwd(x, *params_f32))
    assert h_f32.shape == (B, H)
    assert jnp.allclose(h_f32, ref, atol=1e-5, rtol=1e-5)

    # --- bf16 MXU operands (perf feedback): f32 accumulation + f32 gate math kept;
    # tolerance loosened only for bf16 operand rounding.
    params_bf16 = prepare_lstm_params(w_ih, w_hh, b_ih, b_hh, matmul_dtype=jnp.bfloat16)
    h_bf16 = jax.block_until_ready(fwd(x, *params_bf16))
    assert h_bf16.shape == (B, H)
    assert jnp.allclose(h_bf16, ref, atol=5e-2, rtol=5e-2)

    print("KERNEL_OK")
</pallas_src>

<mosaic_0001>
module attributes {stable_mosaic.version = 11 : i64} {
  func.func @_lstm_kernel(%arg0: memref<2x8x4xf32, #tpu.memory_space<vmem>>, %arg1: memref<4x128xf32, #tpu.memory_space<vmem>>, %arg2: memref<32x128xf32, #tpu.memory_space<vmem>>, %arg3: memref<1x128xf32, #tpu.memory_space<vmem>>, %arg4: memref<2x32xf32, #tpu.memory_space<vmem>>) attributes {dimension_semantics = [], scalar_prefetch = 0 : i64, scratch_operands = 0 : i64, tpu.core_type = #tpu.core_type<tc>} {
    %c0 = arith.constant 0 : index
    %c0_0 = arith.constant 0 : index
    %0 = vector.load %arg2[%c0, %c0_0] : memref<32x128xf32, #tpu.memory_space<vmem>>, vector<32x128xf32>
    %c0_1 = arith.constant 0 : index
    %c0_2 = arith.constant 0 : index
    %1 = vector.load %arg3[%c0_1, %c0_2] : memref<1x128xf32, #tpu.memory_space<vmem>>, vector<1x128xf32>
    %c0_3 = arith.constant 0 : index
    %c0_4 = arith.constant 0 : index
    %c0_5 = arith.constant 0 : index
    %2 = vector.load %arg0[%c0_3, %c0_4, %c0_5] : memref<2x8x4xf32, #tpu.memory_space<vmem>>, vector<2x8x4xf32>
    %3 = tpu.transpose %2, [1, 0, 2] : vector<2x8x4xf32> -> vector<8x2x4xf32>
    %4 = vector.shape_cast %3 : vector<8x2x4xf32> to vector<16x4xf32>
    %c0_6 = arith.constant 0 : index
    %c0_7 = arith.constant 0 : index
    %5 = vector.load %arg1[%c0_6, %c0_7] : memref<4x128xf32, #tpu.memory_space<vmem>>, vector<4x128xf32>
    %cst = arith.constant dense<0.000000e+00> : vector<16x128xf32>
    %6 = tpu.matmul %4, %5, %cst {dimension_numbers = #tpu.dot_dimension_numbers<[1], [0], [0], [1], [0, 0, 1, 1], [], []>} : vector<16x4xf32>, vector<4x128xf32>, vector<16x128xf32> -> vector<16x128xf32>
    %7 = vector.broadcast %1 : vector<1x128xf32> to vector<16x128xf32>
    %8 = arith.addf %6, %7 : vector<16x128xf32>
    %cst_8 = arith.constant 0.000000e+00 : f32
    %9 = vector.broadcast %cst_8 : f32 to vector<2x32xf32>
    %cst_9 = arith.constant 0.000000e+00 : f32
    %10 = vector.broadcast %cst_9 : f32 to vector<2x32xf32>
    %11 = vector.extract_strided_slice %8 {offsets = [0, 0], sizes = [2, 128], strides = [1, 1]} : vector<16x128xf32> to vector<2x128xf32>
    %cst_10 = arith.constant dense<0.000000e+00> : vector<2x128xf32>
    %12 = tpu.matmul %9, %0, %cst_10 {dimension_numbers = #tpu.dot_dimension_numbers<[1], [0], [0], [1], [0, 0, 1, 1], [], []>} : vector<2x32xf32>, vector<32x128xf32>, vector<2x128xf32> -> vector<2x128xf32>
    %13 = arith.addf %11, %12 : vector<2x128xf32>
    %14 = vector.extract_strided_slice %13 {offsets = [0, 0], sizes = [2, 96], strides = [1, 1]} : vector<2x128xf32> to vector<2x96xf32>
    %15 = arith.negf %14 : vector<2x96xf32>
    %16 = math.exp %15 : vector<2x96xf32>
    %cst_11 = arith.constant 1.000000e+00 : f32
    %17 = vector.broadcast %cst_11 : f32 to vector<2x96xf32>
    %18 = arith.addf %17, %16 : vector<2x96xf32>
    %19 = arith.divf %17, %18 : vector<2x96xf32>
    %20 = vector.extract_strided_slice %13 {offsets = [0, 96], sizes = [2, 32], strides = [1, 1]} : vector<2x128xf32> to vector<2x32xf32>
    %21 = math.tanh %20 : vector<2x32xf32>
    %22 = vector.extract_strided_slice %19 {offsets = [0, 0], sizes = [2, 32], strides = [1, 1]} : vector<2x96xf32> to vector<2x32xf32>
    %23 = vector.extract_strided_slice %19 {offsets = [0, 32], sizes = [2, 32], strides = [1, 1]} : vector<2x96xf32> to vector<2x32xf32>
    %24 = vector.extract_strided_slice %19 {offsets = [0, 64], sizes = [2, 32], strides = [1, 1]} : vector<2x96xf32> to vector<2x32xf32>
    %25 = arith.mulf %23, %10 : vector<2x32xf32>
    %26 = arith.mulf %22, %21 : vector<2x32xf32>
    %27 = arith.addf %25, %26 : vector<2x32xf32>
    %28 = math.tanh %27 : vector<2x32xf32>
    %29 = arith.mulf %24, %28 : vector<2x32xf32>
    %30 = vector.extract_strided_slice %8 {offsets = [2, 0], sizes = [2, 128], strides = [1, 1]} : vector<16x128xf32> to vector<2x128xf32>
    %cst_12 = arith.constant dense<0.000000e+00> : vector<2x128xf32>
    %31 = tpu.matmul %29, %0, %cst_12 {dimension_numbers = #tpu.dot_dimension_numbers<[1], [0], [0], [1], [0, 0, 1, 1], [], []>} : vector<2x32xf32>, vector<32x128xf32>, vector<2x128xf32> -> vector<2x128xf32>
    %32 = arith.addf %30, %31 : vector<2x128xf32>
    %33 = vector.extract_strided_slice %32 {offsets = [0, 0], sizes = [2, 96], strides = [1, 1]} : vector<2x128xf32> to vector<2x96xf32>
    %34 = arith.negf %33 : vector<2x96xf32>
    %35 = math.exp %34 : vector<2x96xf32>
    %cst_13 = arith.constant 1.000000e+00 : f32
    %36 = vector.broadcast %cst_13 : f32 to vector<2x96xf32>
    %37 = arith.addf %36, %35 : vector<2x96xf32>
    %38 = arith.divf %36, %37 : vector<2x96xf32>
    %39 = vector.extract_strided_slice %32 {offsets = [0, 96], sizes = [2, 32], strides = [1, 1]} : vector<2x128xf32> to vector<2x32xf32>
    %40 = math.tanh %39 : vector<2x32xf32>
    %41 = vector.extract_strided_slice %38 {offsets = [0, 0], sizes = [2, 32], strides = [1, 1]} : vector<2x96xf32> to vector<2x32xf32>
    %42 = vector.extract_strided_slice %38 {offsets = [0, 32], sizes = [2, 32], strides = [1, 1]} : vector<2x96xf32> to vector<2x32xf32>
    %43 = vector.extract_strided_slice %38 {offsets = [0, 64], sizes = [2, 32], strides = [1, 1]} : vector<2x96xf32> to vector<2x32xf32>
    %44 = arith.mulf %42, %27 : vector<2x32xf32>
    %45 = arith.mulf %41, %40 : vector<2x32xf32>
    %46 = arith.addf %44, %45 : vector<2x32xf32>
    %47 = math.tanh %46 : vector<2x32xf32>
    %48 = arith.mulf %43, %47 : vector<2x32xf32>
    %49 = vector.extract_strided_slice %8 {offsets = [4, 0], sizes = [2, 128], strides = [1, 1]} : vector<16x128xf32> to vector<2x128xf32>
    %cst_14 = arith.constant dense<0.000000e+00> : vector<2x128xf32>
    %50 = tpu.matmul %48, %0, %cst_14 {dimension_numbers = #tpu.dot_dimension_numbers<[1], [0], [0], [1], [0, 0, 1, 1], [], []>} : vector<2x32xf32>, vector<32x128xf32>, vector<2x128xf32> -> vector<2x128xf32>
    %51 = arith.addf %49, %50 : vector<2x128xf32>
    %52 = vector.extract_strided_slice %51 {offsets = [0, 0], sizes = [2, 96], strides = [1, 1]} : vector<2x128xf32> to vector<2x96xf32>
    %53 = arith.negf %52 : vector<2x96xf32>
    %54 = math.exp %53 : vector<2x96xf32>
    %cst_15 = arith.constant 1.000000e+00 : f32
    %55 = vector.broadcast %cst_15 : f32 to vector<2x96xf32>
    %56 = arith.addf %55, %54 : vector<2x96xf32>
    %57 = arith.divf %55, %56 : vector<2x96xf32>
    %58 = vector.extract_strided_slice %51 {offsets = [0, 96], sizes = [2, 32], strides = [1, 1]} : vector<2x128xf32> to vector<2x32xf32>
    %59 = math.tanh %58 : vector<2x32xf32>
    %60 = vector.extract_strided_slice %57 {offsets = [0, 0], sizes = [2, 32], strides = [1, 1]} : vector<2x96xf32> to vector<2x32xf32>
    %61 = vector.extract_strided_slice %57 {offsets = [0, 32], sizes = [2, 32], strides = [1, 1]} : vector<2x96xf32> to vector<2x32xf32>
    %62 = vector.extract_strided_slice %57 {offsets = [0, 64], sizes = [2, 32], strides = [1, 1]} : vector<2x96xf32> to vector<2x32xf32>
    %63 = arith.mulf %61, %46 : vector<2x32xf32>
    %64 = arith.mulf %60, %59 : vector<2x32xf32>
    %65 = arith.addf %63, %64 : vector<2x32xf32>
    %66 = math.tanh %65 : vector<2x32xf32>
    %67 = arith.mulf %62, %66 : vector<2x32xf32>
    %68 = vector.extract_strided_slice %8 {offsets = [6, 0], sizes = [2, 128], strides = [1, 1]} : vector<16x128xf32> to vector<2x128xf32>
    %cst_16 = arith.constant dense<0.000000e+00> : vector<2x128xf32>
    %69 = tpu.matmul %67, %0, %cst_16 {dimension_numbers = #tpu.dot_dimension_numbers<[1], [0], [0], [1], [0, 0, 1, 1], [], []>} : vector<2x32xf32>, vector<32x128xf32>, vector<2x128xf32> -> vector<2x128xf32>
    %70 = arith.addf %68, %69 : vector<2x128xf32>
    %71 = vector.extract_strided_slice %70 {offsets = [0, 0], sizes = [2, 96], strides = [1, 1]} : vector<2x128xf32> to vector<2x96xf32>
    %72 = arith.negf %71 : vector<2x96xf32>
    %73 = math.exp %72 : vector<2x96xf32>
    %cst_17 = arith.constant 1.000000e+00 : f32
    %74 = vector.broadcast %cst_17 : f32 to vector<2x96xf32>
    %75 = arith.addf %74, %73 : vector<2x96xf32>
    %76 = arith.divf %74, %75 : vector<2x96xf32>
    %77 = vector.extract_strided_slice %70 {offsets = [0, 96], sizes = [2, 32], strides = [1, 1]} : vector<2x128xf32> to vector<2x32xf32>
    %78 = math.tanh %77 : vector<2x32xf32>
    %79 = vector.extract_strided_slice %76 {offsets = [0, 0], sizes = [2, 32], strides = [1, 1]} : vector<2x96xf32> to vector<2x32xf32>
    %80 = vector.extract_strided_slice %76 {offsets = [0, 32], sizes = [2, 32], strides = [1, 1]} : vector<2x96xf32> to vector<2x32xf32>
    %81 = vector.extract_strided_slice %76 {offsets = [0, 64], sizes = [2, 32], strides = [1, 1]} : vector<2x96xf32> to vector<2x32xf32>
    %82 = arith.mulf %80, %65 : vector<2x32xf32>
    %83 = arith.mulf %79, %78 : vector<2x32xf32>
    %84 = arith.addf %82, %83 : vector<2x32xf32>
    %85 = math.tanh %84 : vector<2x32xf32>
    %86 = arith.mulf %81, %85 : vector<2x32xf32>
    %87 = vector.extract_strided_slice %8 {offsets = [8, 0], sizes = [2, 128], strides = [1, 1]} : vector<16x128xf32> to vector<2x128xf32>
    %cst_18 = arith.constant dense<0.000000e+00> : vector<2x128xf32>
    %88 = tpu.matmul %86, %0, %cst_18 {dimension_numbers = #tpu.dot_dimension_numbers<[1], [0], [0], [1], [0, 0, 1, 1], [], []>} : vector<2x32xf32>, vector<32x128xf32>, vector<2x128xf32> -> vector<2x128xf32>
    %89 = arith.addf %87, %88 : vector<2x128xf32>
    %90 = vector.extract_strided_slice %89 {offsets = [0, 0], sizes = [2, 96], strides = [1, 1]} : vector<2x128xf32> to vector<2x96xf32>
    %91 = arith.negf %90 : vector<2x96xf32>
    %92 = math.exp %91 : vector<2x96xf32>
    %cst_19 = arith.constant 1.000000e+00 : f32
    %93 = vector.broadcast %cst_19 : f32 to vector<2x96xf32>
    %94 = arith.addf %93, %92 : vector<2x96xf32>
    %95 = arith.divf %93, %94 : vector<2x96xf32>
    %96 = vector.extract_strided_slice %89 {offsets = [0, 96], sizes = [2, 32], strides = [1, 1]} : vector<2x128xf32> to vector<2x32xf32>
    %97 = math.tanh %96 : vector<2x32xf32>
    %98 = vector.extract_strided_slice %95 {offsets = [0, 0], sizes = [2, 32], strides = [1, 1]} : vector<2x96xf32> to vector<2x32xf32>
    %99 = vector.extract_strided_slice %95 {offsets = [0, 32], sizes = [2, 32], strides = [1, 1]} : vector<2x96xf32> to vector<2x32xf32>
    %100 = vector.extract_strided_slice %95 {offsets = [0, 64], sizes = [2, 32], strides = [1, 1]} : vector<2x96xf32> to vector<2x32xf32>
    %101 = arith.mulf %99, %84 : vector<2x32xf32>
    %102 = arith.mulf %98, %97 : vector<2x32xf32>
    %103 = arith.addf %101, %102 : vector<2x32xf32>
    %104 = math.tanh %103 : vector<2x32xf32>
    %105 = arith.mulf %100, %104 : vector<2x32xf32>
    %106 = vector.extract_strided_slice %8 {offsets = [10, 0], sizes = [2, 128], strides = [1, 1]} : vector<16x128xf32> to vector<2x128xf32>
    %cst_20 = arith.constant dense<0.000000e+00> : vector<2x128xf32>
    %107 = tpu.matmul %105, %0, %cst_20 {dimension_numbers = #tpu.dot_dimension_numbers<[1], [0], [0], [1], [0, 0, 1, 1], [], []>} : vector<2x32xf32>, vector<32x128xf32>, vector<2x128xf32> -> vector<2x128xf32>
    %108 = arith.addf %106, %107 : vector<2x128xf32>
    %109 = vector.extract_strided_slice %108 {offsets = [0, 0], sizes = [2, 96], strides = [1, 1]} : vector<2x128xf32> to vector<2x96xf32>
    %110 = arith.negf %109 : vector<2x96xf32>
    %111 = math.exp %110 : vector<2x96xf32>
    %cst_21 = arith.constant 1.000000e+00 : f32
    %112 = vector.broadcast %cst_21 : f32 to vector<2x96xf32>
    %113 = arith.addf %112, %111 : vector<2x96xf32>
    %114 = arith.divf %112, %113 : vector<2x96xf32>
    %115 = vector.extract_strided_slice %108 {offsets = [0, 96], sizes = [2, 32], strides = [1, 1]} : vector<2x128xf32> to vector<2x32xf32>
    %116 = math.tanh %115 : vector<2x32xf32>
    %117 = vector.extract_strided_slice %114 {offsets = [0, 0], sizes = [2, 32], strides = [1, 1]} : vector<2x96xf32> to vector<2x32xf32>
    %118 = vector.extract_strided_slice %114 {offsets = [0, 32], sizes = [2, 32], strides = [1, 1]} : vector<2x96xf32> to vector<2x32xf32>
    %119 = vector.extract_strided_slice %114 {offsets = [0, 64], sizes = [2, 32], strides = [1, 1]} : vector<2x96xf32> to vector<2x32xf32>
    %120 = arith.mulf %118, %103 : vector<2x32xf32>
    %121 = arith.mulf %117, %116 : vector<2x32xf32>
    %122 = arith.addf %120, %121 : vector<2x32xf32>
    %123 = math.tanh %122 : vector<2x32xf32>
    %124 = arith.mulf %119, %123 : vector<2x32xf32>
    %125 = vector.extract_strided_slice %8 {offsets = [12, 0], sizes = [2, 128], strides = [1, 1]} : vector<16x128xf32> to vector<2x128xf32>
    %cst_22 = arith.constant dense<0.000000e+00> : vector<2x128xf32>
    %126 = tpu.matmul %124, %0, %cst_22 {dimension_numbers = #tpu.dot_dimension_numbers<[1], [0], [0], [1], [0, 0, 1, 1], [], []>} : vector<2x32xf32>, vector<32x128xf32>, vector<2x128xf32> -> vector<2x128xf32>
    %127 = arith.addf %125, %126 : vector<2x128xf32>
    %128 = vector.extract_strided_slice %127 {offsets = [0, 0], sizes = [2, 96], strides = [1, 1]} : vector<2x128xf32> to vector<2x96xf32>
    %129 = arith.negf %128 : vector<2x96xf32>
    %130 = math.exp %129 : vector<2x96xf32>
    %cst_23 = arith.constant 1.000000e+00 : f32
    %131 = vector.broadcast %cst_23 : f32 to vector<2x96xf32>
    %132 = arith.addf %131, %130 : vector<2x96xf32>
    %133 = arith.divf %131, %132 : vector<2x96xf32>
    %134 = vector.extract_strided_slice %127 {offsets = [0, 96], sizes = [2, 32], strides = [1, 1]} : vector<2x128xf32> to vector<2x32xf32>
    %135 = math.tanh %134 : vector<2x32xf32>
    %136 = vector.extract_strided_slice %133 {offsets = [0, 0], sizes = [2, 32], strides = [1, 1]} : vector<2x96xf32> to vector<2x32xf32>
    %137 = vector.extract_strided_slice %133 {offsets = [0, 32], sizes = [2, 32], strides = [1, 1]} : vector<2x96xf32> to vector<2x32xf32>
    %138 = vector.extract_strided_slice %133 {offsets = [0, 64], sizes = [2, 32], strides = [1, 1]} : vector<2x96xf32> to vector<2x32xf32>
    %139 = arith.mulf %137, %122 : vector<2x32xf32>
    %140 = arith.mulf %136, %135 : vector<2x32xf32>
    %141 = arith.addf %139, %140 : vector<2x32xf32>
    %142 = math.tanh %141 : vector<2x32xf32>
    %143 = arith.mulf %138, %142 : vector<2x32xf32>
    %144 = vector.extract_strided_slice %8 {offsets = [14, 0], sizes = [2, 128], strides = [1, 1]} : vector<16x128xf32> to vector<2x128xf32>
    %cst_24 = arith.constant dense<0.000000e+00> : vector<2x128xf32>
    %145 = tpu.matmul %143, %0, %cst_24 {dimension_numbers = #tpu.dot_dimension_numbers<[1], [0], [0], [1], [0, 0, 1, 1], [], []>} : vector<2x32xf32>, vector<32x128xf32>, vector<2x128xf32> -> vector<2x128xf32>
    %146 = arith.addf %144, %145 : vector<2x128xf32>
    %147 = vector.extract_strided_slice %146 {offsets = [0, 0], sizes = [2, 96], strides = [1, 1]} : vector<2x128xf32> to vector<2x96xf32>
    %148 = arith.negf %147 : vector<2x96xf32>
    %149 = math.exp %148 : vector<2x96xf32>
    %cst_25 = arith.constant 1.000000e+00 : f32
    %150 = vector.broadcast %cst_25 : f32 to vector<2x96xf32>
    %151 = arith.addf %150, %149 : vector<2x96xf32>
    %152 = arith.divf %150, %151 : vector<2x96xf32>
    %153 = vector.extract_strided_slice %146 {offsets = [0, 96], sizes = [2, 32], strides = [1, 1]} : vector<2x128xf32> to vector<2x32xf32>
    %154 = math.tanh %153 : vector<2x32xf32>
    %155 = vector.extract_strided_slice %152 {offsets = [0, 0], sizes = [2, 32], strides = [1, 1]} : vector<2x96xf32> to vector<2x32xf32>
    %156 = vector.extract_strided_slice %152 {offsets = [0, 32], sizes = [2, 32], strides = [1, 1]} : vector<2x96xf32> to vector<2x32xf32>
    %157 = vector.extract_strided_slice %152 {offsets = [0, 64], sizes = [2, 32], strides = [1, 1]} : vector<2x96xf32> to vector<2x32xf32>
    %158 = arith.mulf %156, %141 : vector<2x32xf32>
    %159 = arith.mulf %155, %154 : vector<2x32xf32>
    %160 = arith.addf %158, %159 : vector<2x32xf32>
    %161 = math.tanh %160 : vector<2x32xf32>
    %162 = arith.mulf %157, %161 : vector<2x32xf32>
    %c0_26 = arith.constant 0 : index
    %c0_27 = arith.constant 0 : index
    %163 = vector.load %arg4[%c0_26, %c0_27] : memref<2x32xf32, #tpu.memory_space<vmem>>, vector<2x32xf32>
    tpu.vector_store %arg4[%c0_26, %c0_27], %162 {strides = array<i32>} : memref<2x32xf32, #tpu.memory_space<vmem>>, vector<2x32xf32>,
    return
  }
}

</mosaic_0001>

<bundles_post_ra>
// kernel: time_series_encoder_forward.1
= control target key start
LH: loop header
LB: loop body
LE: loop exit
PB: predicated region body
PF: predicated region fallthrough
CT: control target
= control target key end

     0   :  { %9 = vsyncpa [#allocation3], 0  ;;  %s1012_s0 = inlined_call_operand.vmem [shape: f32[2,8,4], index: 0, kind: input, shape index: {}]   ;;  %s1013_s1 = inlined_call_operand.vmem [shape: f32[4,128], index: 1, kind: input, shape index: {}]   ;;  %s1014_s2 = inlined_call_operand.hbm [shape: f32[32,128], index: 2, kind: input, shape index: {}]   ;;  %s1015_s3 = inlined_call_operand.vmem [shape: f32[1,128], index: 3, kind: input, shape index: {}]   ;;  %s1016_s4 = inlined_call_operand.hbm [shape: f32[2,32], index: 4, kind: output, shape index: {}]  }
   0x1   :  { %10 = vsyncpa [#allocation4], 0  ;;  %s19_s17 = sshll.u32 %s1014_s2, 4  ;;  %s869_s18 = smov [#allocation2]   ;;  %s20_s17 = int_to_ptr.hbm [resolvable:$true] %s19_s17 }
   0x2   :  { %s21_s19 = sshll.u32 %s869_s18, 4  ;;  %s870_s20 = smov 128   ;;  %s22_s19 = int_to_ptr.vmem [resolvable:$true] %s21_s19 }
   0x3   :  { %s871_s21 = smov 8  }
   0x4   :  { %27 = dma.hbm_to_vmem [thread:$0]  %s20_s17, 512, %s22_s19, [#allocation3], %s870_s20, %s870_s20, %s871_s21  }
   0x5   :  { %865 = dma.done.wait [#allocation3], 512  }
   0x6   :  { %866 = vsyncadd [#allocation3], 4294966784  ;;  %v872_v0 = vmov 1983009808   ;;  %vm128_vm0 = vcmask 1043456   ;;  %v37_v5 = vld [vmem:[#allocation2 + $0x18] sm:$0xff] }
   0x7   :  { %v45_v1 = vunpack.c.l.s4 %v872_v0  ;;  %v873_v3 = vmov 1934713408   ;;  %v36_v6 = vld [vmem:[#allocation2 + $0x10] sm:$0xff]  ;;  %v94_v7 = vld [vmem:[%s1013_s1] sm:$0xf]  ;;  %171 = vmatpush.msra.mxu1 %v37_v5  ;;  %v919_v9 = vld [vmem:[%s1012_s0 + $0x8] sm:$0xff]  ;;  %234 = vmatpush.msra.mxu2 %v37_v5 }
   0x8   :  { %v67_v4 = vunpack.c.l.s4 %v873_v3  ;;  %725 = vmatpush.msk.msra.mxu0 %vm128_vm0, %v94_v7  ;;  %v914_v8 = vld [vmem:[%s1012_s0] sm:$0xff]  ;;  %v35_v10 = vld [vmem:[#allocation2 + $0x8] sm:$0xff]  ;;  %304 = vmatpush.msra.mxu3 %v37_v5  ;;  %vm42_vm1 = vcmask 1047556   ;;  %v34_v16 = vld [vmem:[#allocation2] sm:$0xff]  ;;  %v874_v21 = vmov 0.0   ;;  %vm123_vm2 = vcmask 31744  }
   0x9   :  { %v906_v2 = vunpack.c.0.s8 %v45_v1  ;;  %172 = vmatpush.msra.mxu1 %v36_v6  ;;  %235 = vmatpush.msra.mxu2 %v36_v6  ;;  %v937_v27 = vld [vmem:[%s1015_s3] ss:$0 sm:$0xff]  ;;  %s875_s27 = smov 32   ;;  %s876_s3 = smov 64   ;;  %vm155_vm7 = vcmask 261120  }
   0xa   :  { %v925_v13 = vunpack.c.0.s8 %v67_v4  ;;  %580 = vmatpush.msrb.mxu0 %v37_v5  ;;  %305 = vmatpush.msra.mxu3 %v36_v6  ;;  %s877_s28 = smov [#allocation5]   ;;  %s715_s6 = sshll.u32 %s1016_s4, 4  ;;  %s716_s6 = int_to_ptr.hbm [resolvable:$true] %s715_s6 }
   0xb   :  { %v47_v11 = vperm.slane %v914_v8, %v906_v2  ;;  %v57_v12 = vperm.slane %v919_v9, %v906_v2  ;;  %173 = vmatpush.msra.mxu1 %v35_v10  ;;  %236 = vmatpush.msra.mxu2 %v35_v10  ;;  %s713_s29 = sshll.u32 %s877_s28, 4  ;;  %s714_s29 = int_to_ptr.vmem [resolvable:$true] %s713_s29 }
   0xc   :  { %581 = vmatpush.msrb.mxu0 %v36_v6  ;;  %306 = vmatpush.msra.mxu3 %v35_v10 }
   0xd   :  { %v62_v14 = vrot.slane %v57_v12, 4  ;;  %v64_v15 = vrot.slane %v47_v11, 4  ;;  %174 = vmatpush.msra.mxu1 %v34_v16  ;;  %237 = vmatpush.msra.mxu2 %v34_v16 }
   0xe   :  { %582 = vmatpush.msrb.mxu0 %v35_v10  ;;  %175 = vmatmul.f32.vlgmr.msra.gmra.mxu1 %v874_v21 }
   0xf   :  { %v63_v17 = vsel %vm42_vm1, %v62_v14, %v47_v11  ;;  %v65_v18 = vsel %vm42_vm1, %v57_v12, %v64_v15  ;;  %307 = vmatpush.msra.mxu3 %v34_v16  ;;  %374 = vmatpush.msrb.mxu1 %v37_v5 }
  0x10   :  { %v69_v19 = vperm.slane %v63_v17, %v925_v13  ;;  %v73_v20 = vperm.slane %v65_v18, %v925_v13  ;;  %444 = vmatpush.msrb.mxu2 %v37_v5  ;;  %583 = vmatpush.msrb.mxu0 %v34_v16 }
  0x11   :  { %510 = vmatpush.msrb.mxu3 %v37_v5  ;;  %375 = vmatpush.msrb.mxu1 %v36_v6 }
  0x12   :  { %v86_v22 = vrot.slane %v69_v19, 4  ;;  %v88_v23 = vrot.slane %v73_v20, 4  ;;  %106 = vst [vmem:[#allocation1] ss:$4 sm:$0xff] %v69_v19  ;;  %445 = vmatpush.msrb.mxu2 %v36_v6 }
  0x13   :  { %110 = vst [vmem:[#allocation1 + $0x2] ss:$4 sm:$0xff] %v73_v20  ;;  %511 = vmatpush.msrb.mxu3 %v36_v6  ;;  %376 = vmatpush.msrb.mxu1 %v35_v10 }
  0x14   :  { %v87_v24 = vsel %vm42_vm1, 0.0, %v86_v22  ;;  %v89_v25 = vsel %vm42_vm1, 0.0, %v88_v23  ;;  %446 = vmatpush.msrb.mxu2 %v35_v10 }
  0x15   :  { %108 = vst [vmem:[#allocation1 + $0x1] ss:$4 sm:$0xff] %v87_v24  ;;  %512 = vmatpush.msrb.mxu3 %v35_v10  ;;  %377 = vmatpush.msrb.mxu1 %v34_v16 }
  0x16   :  { %112 = vst [vmem:[#allocation1 + $0x3] ss:$4 sm:$0xff] %v89_v25  ;;  %447 = vmatpush.msrb.mxu2 %v34_v16 }
  0x17   :  { %513 = vmatpush.msrb.mxu3 %v34_v16  ;;  %650 = vmatpush.msra.mxu1 %v37_v5 }
  0x19   :  { %651 = vmatpush.msra.mxu1 %v36_v6 }
  0x1b   :  { %652 = vmatpush.msra.mxu1 %v35_v10 }
  0x1d   :  { %v121_v26 = vld.sshfl [vmem:[#allocation1] sm:$0xff pattern:$0x73625140]  ;;  %653 = vmatpush.msra.mxu1 %v34_v16 }
  0x1e   :  { %726 = vmatmul.msk.f32.vlgmr.msra.gmra.mxu0 %vm123_vm2, %v121_v26 }
  0x8b   :  { %v176_v29 = vpop.f32.mrf.mxu1 }
  0x9b   :  { %v149_v28 = vpop.f32.mrf.mxu0 }
  0x9c   :  { %v940_v30 = vadd.f32 %v937_v27, %v149_v28 }
  0x9e   :  { %v179_v31 = vadd.f32 %v176_v29, %v940_v30 }
  0xa0   :  { %753 = vtanh.f32 %v179_v31  ;;  %v728_v33 = vmul.f32 -1.442695, %v179_v31 }
  0xa2   :  { %755 = vpow2.f32 %v728_v33 }
  0xa6   :  { %v754_v32 = vpop.eup %753 }
  0xa7   :  { %202 = vrot.lane.b32.xlu0 %v754_v32, %s875_s27 }
  0xa8   :  { %v756_v34 = vpop.eup %755 }
  0xa9   :  { %v183_v35 = vadd.f32 1.0, %v756_v34 }
  0xab   :  { %757 = vrcp.f32 %v183_v35  ;;  %v195_v41 = vand.u32 2147483648, %v183_v35  ;;  %vm189_vm4 = vweird.f32 %v183_v35  ;;  %v193_v42 = vand.u32 2147483647, %v183_v35 }
  0xad   :  { %v196_v44 = vor.u32 1.1754944e-38, %v195_v41  ;;  %vm194_vm6 = vcmp.eq.f32.partialorder %v193_v42, 8.507059e+37 }
  0xb1   :  { %v758_v36 = vpop.eup %757 }
  0xb2   :  { %v185_v37 = vmul.f32 %v758_v36, %v183_v35  ;;  %vm190_vm3 = vweird.f32 %v758_v36 }
  0xb3   :  { %vm191_vm5 = vmor %vm189_vm4, %vm190_vm3 }
  0xb4   :  { %v186_v38 = vsub.f32 1.0, %v185_v37 }
  0xb6   :  { %v187_v39 = vmul.f32 %v758_v36, %v186_v38 }
  0xb8   :  { %v188_v40 = vadd.f32 %v758_v36, %v187_v39 }
  0xba   :  { %v192_v43 = vsel %vm191_vm5, %v758_v36, %v188_v40 }
  0xbb   :  { %v197_v46 = vsel %vm194_vm6, %v196_v44, %v192_v43 }
  0xbc   :  { %v200_v48 = vmul.f32 0.0, %v197_v46 }
 0x119   :  { %v203_v45 = vpop.permute.xlu0 %202 }
 0x11a   :  { %v205_v47 = vmul.f32 %v203_v45, %v197_v46 }
 0x11c   :  { %207 = vrot.lane.b32.xlu0 %v205_v47, %s875_s27 }
 0x18e   :  { %v208_v49 = vpop.permute.xlu0 %207 }
 0x18f   :  { %v210_v50 = vadd.f32 %v208_v49, %v200_v48 }
 0x191   :  { %759 = vtanh.f32 %v210_v50  ;;  %v267_v14 = vrot.slane %v210_v50, 6 }
 0x197   :  { %v760_v51 = vpop.eup %759 }
 0x198   :  { %213 = vrot.lane.b32.xlu1 %v760_v51, %s875_s27 }
 0x20a   :  { %v214_v52 = vpop.permute.xlu1 %213 }
 0x20b   :  { %v216_v53 = vmul.f32 %v214_v52, %v197_v46 }
 0x20d   :  { %218 = vrot.lane.b32.xlu1 %v216_v53, %s876_s3 }
 0x27f   :  { %v219_v54 = vpop.permute.xlu1 %218 }
 0x280   :  { %729 = vmatmul.msk.f32.vlgmr.msra.gmra.mxu2 %vm155_vm7, %v219_v54 }
 0x303   :  { %v239_v55 = vpop.f32.mrf.mxu2 }
 0x304   :  { %v243_v56 = vrot.slane %v239_v55, 6 }
 0x306   :  { %v245_v57 = vadd.f32 %v243_v56, %v940_v30 }
 0x308   :  { %761 = vtanh.f32 %v245_v57  ;;  %v730_v59 = vmul.f32 -1.442695, %v245_v57 }
 0x30a   :  { %763 = vpow2.f32 %v730_v59 }
 0x30e   :  { %v762_v58 = vpop.eup %761 }
 0x30f   :  { %271 = vrot.lane.b32.xlu2 %v762_v58, %s875_s27 }
 0x310   :  { %v764_v60 = vpop.eup %763 }
 0x311   :  { %v249_v61 = vadd.f32 1.0, %v764_v60 }
 0x313   :  { %765 = vrcp.f32 %v249_v61  ;;  %v261_v4 = vand.u32 2147483648, %v249_v61  ;;  %vm255_vm9 = vweird.f32 %v249_v61  ;;  %v259_v5 = vand.u32 2147483647, %v249_v61 }
 0x315   :  { %v262_v7 = vor.u32 1.1754944e-38, %v261_v4  ;;  %vm260_vm11 = vcmp.eq.f32.partialorder %v259_v5, 8.507059e+37 }
 0x319   :  { %v766_v62 = vpop.eup %765 }
 0x31a   :  { %v251_v63 = vmul.f32 %v766_v62, %v249_v61  ;;  %vm256_vm8 = vweird.f32 %v766_v62 }
 0x31b   :  { %vm257_vm10 = vmor %vm255_vm9, %vm256_vm8 }
 0x31c   :  { %v252_v0 = vsub.f32 1.0, %v251_v63 }
 0x31e   :  { %v253_v1 = vmul.f32 %v766_v62, %v252_v0 }
 0x320   :  { %v254_v3 = vadd.f32 %v766_v62, %v253_v1 }
 0x322   :  { %v258_v6 = vsel %vm257_vm10, %v766_v62, %v254_v3 }
 0x323   :  { %v263_v11 = vsel %vm260_vm11, %v262_v7, %v258_v6 }
 0x324   :  { %v269_v15 = vmul.f32 %v267_v14, %v263_v11 }
 0x369   :  { %v272_v10 = vpop.permute.xlu2 %271 }
 0x36a   :  { %v274_v12 = vmul.f32 %v272_v10, %v263_v11 }
 0x36c   :  { %276 = vrot.lane.b32.xlu2 %v274_v12, %s875_s27 }
 0x3c6   :  { %v277_v16 = vpop.permute.xlu2 %276 }
 0x3c7   :  { %v279_v17 = vadd.f32 %v277_v16, %v269_v15 }
 0x3c9   :  { %767 = vtanh.f32 %v279_v17  ;;  %v337_v44 = vrot.slane %v279_v17, 6 }
 0x3cf   :  { %v768_v18 = vpop.eup %767 }
 0x3d0   :  { %282 = vrot.lane.b32.xlu0 %v768_v18, %s875_s27 }
 0x442   :  { %v283_v19 = vpop.permute.xlu0 %282 }
 0x443   :  { %v285_v20 = vmul.f32 %v283_v19, %v263_v11  ;;  %v41_v19 = vrot.slane %v914_v8, 4 }
 0x445   :  { %v287_v21 = vrot.slane %v285_v20, 2  ;;  %v52_v20 = vrot.slane %v919_v9, 4 }
 0x447   :  { %288 = vrot.lane.b32.xlu1 %v287_v21, %s876_s3  ;;  %v43_v21 = vsel %vm42_vm1, 0.0, %v41_v19 }
 0x4b9   :  { %v289_v22 = vpop.permute.xlu1 %288 }
 0x4ba   :  { %731 = vmatmul.msk.f32.vlgmr.msra.gmra.mxu3 %vm155_vm7, %v289_v22  ;;  %v53_v22 = vsel %vm42_vm1, 0.0, %v52_v20 }
 0x53d   :  { %v309_v23 = vpop.f32.mrf.mxu3 }
 0x53e   :  { %v313_v24 = vrot.slane %v309_v23, 4  ;;  %v51_v23 = vperm.slane %v43_v21, %v906_v2 }
 0x540   :  { %v315_v25 = vadd.f32 %v313_v24, %v940_v30  ;;  %v61_v24 = vperm.slane %v53_v22, %v906_v2 }
 0x542   :  { %769 = vtanh.f32 %v315_v25  ;;  %v732_v28 = vmul.f32 -1.442695, %v315_v25  ;;  %v74_v25 = vrot.slane %v61_v24, 4 }
 0x544   :  { %771 = vpow2.f32 %v732_v28  ;;  %v75_v28 = vsel %vm42_vm1, %v74_v25, %v51_v23 }
 0x548   :  { %v770_v26 = vpop.eup %769 }
 0x549   :  { %341 = vrot.lane.b32.xlu2 %v770_v26, %s875_s27  ;;  %v76_v26 = vrot.slane %v51_v23, 4 }
 0x54a   :  { %v772_v29 = vpop.eup %771 }
 0x54b   :  { %v319_v31 = vadd.f32 1.0, %v772_v29  ;;  %v77_v29 = vsel %vm42_vm1, %v61_v24, %v76_v26 }
 0x54c   :  { %v85_v8 = vperm.slane %v77_v29, %v925_v13 }
 0x54d   :  { %773 = vrcp.f32 %v319_v31  ;;  %v331_v37 = vand.u32 2147483648, %v319_v31  ;;  %vm325_vm13 = vweird.f32 %v319_v31  ;;  %v329_v38 = vand.u32 2147483647, %v319_v31 }
 0x54e   :  { %v92_v9 = vrot.slane %v85_v8, 4  ;;  %118 = vst [vmem:[#allocation1 + $0x22] ss:$4 sm:$0xff] %v85_v8 }
 0x54f   :  { %v332_v40 = vor.u32 1.1754944e-38, %v331_v37  ;;  %vm330_vm15 = vcmp.eq.f32.partialorder %v329_v38, 8.507059e+37 }
 0x553   :  { %v774_v32 = vpop.eup %773 }
 0x554   :  { %v321_v33 = vmul.f32 %v774_v32, %v319_v31  ;;  %vm326_vm12 = vweird.f32 %v774_v32  ;;  %v81_v31 = vperm.slane %v75_v28, %v925_v13 }
 0x555   :  { %vm327_vm14 = vmor %vm325_vm13, %vm326_vm12 }
 0x556   :  { %v322_v34 = vsub.f32 1.0, %v321_v33  ;;  %114 = vst [vmem:[#allocation1 + $0x20] ss:$4 sm:$0xff] %v81_v31 }
 0x558   :  { %v323_v35 = vmul.f32 %v774_v32, %v322_v34  ;;  %v93_v34 = vsel %vm42_vm1, 0.0, %v92_v9 }
 0x559   :  { %120 = vst [vmem:[#allocation1 + $0x23] ss:$4 sm:$0xff] %v93_v34 }
 0x55a   :  { %v324_v36 = vadd.f32 %v774_v32, %v323_v35 }
 0x55c   :  { %v328_v39 = vsel %vm327_vm14, %v774_v32, %v324_v36  ;;  %v90_v32 = vrot.slane %v81_v31, 4 }
 0x55d   :  { %v333_v42 = vsel %vm330_vm15, %v332_v40, %v328_v39 }
 0x55e   :  { %v339_v45 = vmul.f32 %v337_v44, %v333_v42  ;;  %v91_v33 = vsel %vm42_vm1, 0.0, %v90_v32 }
 0x55f   :  { %116 = vst [vmem:[#allocation1 + $0x21] ss:$4 sm:$0xff] %v91_v33 }
 0x566   :  { %v122_v2 = vld.sshfl [vmem:[#allocation1 + $0x20] sm:$0xff pattern:$0x73625140] }
 0x567   :  { %727 = vmatmul.msk.f32.gmra.mxu0 %vm123_vm2, %v122_v2 }
 0x5a3   :  { %v342_v41 = vpop.permute.xlu2 %341 }
 0x5a4   :  { %v344_v43 = vmul.f32 %v342_v41, %v333_v42 }
 0x5a6   :  { %346 = vrot.lane.b32.xlu0 %v344_v43, %s875_s27 }
 0x5e4   :  { %v152_v36 = vpop.f32.mrf.mxu0 }
 0x5e5   :  { %v983_v37 = vadd.f32 %v937_v27, %v152_v36 }
 0x618   :  { %v347_v46 = vpop.permute.xlu0 %346 }
 0x619   :  { %v349_v47 = vadd.f32 %v347_v46, %v339_v45 }
 0x61b   :  { %775 = vtanh.f32 %v349_v47  ;;  %v407_v10 = vrot.slane %v349_v47, 6 }
 0x621   :  { %v776_v48 = vpop.eup %775 }
 0x622   :  { %352 = vrot.lane.b32.xlu1 %v776_v48, %s875_s27 }
 0x694   :  { %v353_v49 = vpop.permute.xlu1 %352 }
 0x695   :  { %v355_v50 = vmul.f32 %v353_v49, %v333_v42 }
 0x697   :  { %v357_v51 = vrot.slane %v355_v50, 4 }
 0x699   :  { %358 = vrot.lane.b32.xlu2 %v357_v51, %s876_s3 }
 0x6f3   :  { %v359_v52 = vpop.permute.xlu2 %358 }
 0x6f4   :  { %733 = vmatmul.msk.f32.vlgmr.msrb.gmra.mxu1 %vm155_vm7, %v359_v52 }
 0x771   :  { %v379_v53 = vpop.f32.mrf.mxu1 }
 0x772   :  { %v383_v54 = vrot.slane %v379_v53, 2 }
 0x774   :  { %v385_v55 = vadd.f32 %v383_v54, %v940_v30 }
 0x776   :  { %777 = vtanh.f32 %v385_v55  ;;  %v734_v57 = vmul.f32 -1.442695, %v385_v55 }
 0x778   :  { %779 = vpow2.f32 %v734_v57 }
 0x77c   :  { %v778_v56 = vpop.eup %777 }
 0x77d   :  { %411 = vrot.lane.b32.xlu0 %v778_v56, %s875_s27 }
 0x77e   :  { %v780_v58 = vpop.eup %779 }
 0x77f   :  { %v389_v59 = vadd.f32 1.0, %v780_v58 }
 0x781   :  { %781 = vrcp.f32 %v389_v59  ;;  %v401_v1 = vand.u32 2147483648, %v389_v59  ;;  %vm395_vm3 = vweird.f32 %v389_v59  ;;  %v399_v3 = vand.u32 2147483647, %v389_v59 }
 0x783   :  { %v402_v4 = vor.u32 1.1754944e-38, %v401_v1  ;;  %vm400_vm5 = vcmp.eq.f32.partialorder %v399_v3, 8.507059e+37 }
 0x787   :  { %v782_v60 = vpop.eup %781 }
 0x788   :  { %v391_v61 = vmul.f32 %v782_v60, %v389_v59  ;;  %vm396_vm0 = vweird.f32 %v782_v60 }
 0x789   :  { %vm397_vm4 = vmor %vm395_vm3, %vm396_vm0 }
 0x78a   :  { %v392_v62 = vsub.f32 1.0, %v391_v61 }
 0x78c   :  { %v393_v63 = vmul.f32 %v782_v60, %v392_v62 }
 0x78e   :  { %v394_v0 = vadd.f32 %v782_v60, %v393_v63 }
 0x790   :  { %v398_v30 = vsel %vm397_vm4, %v782_v60, %v394_v0 }
 0x791   :  { %v403_v6 = vsel %vm400_vm5, %v402_v4, %v398_v30 }
 0x792   :  { %v409_v11 = vmul.f32 %v407_v10, %v403_v6 }
 0x7ef   :  { %v412_v5 = vpop.permute.xlu0 %411 }
 0x7f0   :  { %v414_v7 = vmul.f32 %v412_v5, %v403_v6 }
 0x7f2   :  { %416 = vrot.lane.b32.xlu1 %v414_v7, %s875_s27 }
 0x864   :  { %v417_v12 = vpop.permute.xlu1 %416 }
 0x865   :  { %v963_v14 = vadd.f32 %v417_v12, %v409_v11 }
 0x867   :  { %783 = vtanh.f32 %v963_v14  ;;  %v474_v54 = vrot.slane %v963_v14, 6 }
 0x86d   :  { %v784_v15 = vpop.eup %783 }
 0x86e   :  { %422 = vrot.lane.b32.xlu2 %v784_v15, %s875_s27 }
 0x8c8   :  { %v423_v16 = vpop.permute.xlu2 %422 }
 0x8c9   :  { %v425_v17 = vmul.f32 %v423_v16, %v403_v6 }
 0x8cb   :  { %v427_v18 = vrot.slane %v425_v17, 6 }
 0x8cd   :  { %428 = vrot.lane.b32.xlu0 %v427_v18, %s876_s3 }
 0x93f   :  { %v429_v35 = vpop.permute.xlu0 %428 }
 0x940   :  { %735 = vmatmul.msk.f32.vlgmr.msrb.gmra.mxu2 %vm155_vm7, %v429_v35 }
 0x9c3   :  { %v449_v13 = vpop.f32.mrf.mxu2 }
 0x9c4   :  { %v452_v38 = vadd.f32 %v449_v13, %v983_v37 }
 0x9c6   :  { %785 = vtanh.f32 %v452_v38  ;;  %v736_v40 = vmul.f32 -1.442695, %v452_v38 }
 0x9c8   :  { %787 = vpow2.f32 %v736_v40 }
 0x9cc   :  { %v786_v39 = vpop.eup %785 }
 0x9cd   :  { %478 = vrot.lane.b32.xlu1 %v786_v39, %s875_s27 }
 0x9ce   :  { %v788_v41 = vpop.eup %787 }
 0x9cf   :  { %v456_v42 = vadd.f32 1.0, %v788_v41 }
 0x9d1   :  { %789 = vrcp.f32 %v456_v42  ;;  %v468_v27 = vand.u32 2147483648, %v456_v42  ;;  %vm462_vm2 = vweird.f32 %v456_v42  ;;  %v466_v48 = vand.u32 2147483647, %v456_v42 }
 0x9d3   :  { %v469_v50 = vor.u32 1.1754944e-38, %v468_v27  ;;  %vm467_vm8 = vcmp.eq.f32.partialorder %v466_v48, 8.507059e+37 }
 0x9d7   :  { %v790_v43 = vpop.eup %789 }
 0x9d8   :  { %v458_v44 = vmul.f32 %v790_v43, %v456_v42  ;;  %vm463_vm1 = vweird.f32 %v790_v43 }
 0x9d9   :  { %vm464_vm6 = vmor %vm462_vm2, %vm463_vm1  ;;  %vm706_vm1 = vcmask 261126  }
 0x9da   :  { %v459_v45 = vsub.f32 1.0, %v458_v44 }
 0x9dc   :  { %v460_v46 = vmul.f32 %v790_v43, %v459_v45 }
 0x9de   :  { %v461_v47 = vadd.f32 %v790_v43, %v460_v46 }
 0x9e0   :  { %v465_v49 = vsel %vm464_vm6, %v790_v43, %v461_v47 }
 0x9e1   :  { %v470_v52 = vsel %vm467_vm8, %v469_v50, %v465_v49 }
 0x9e2   :  { %v476_v55 = vmul.f32 %v474_v54, %v470_v52 }
 0xa3f   :  { %v479_v51 = vpop.permute.xlu1 %478 }
 0xa40   :  { %v481_v53 = vmul.f32 %v479_v51, %v470_v52 }
 0xa42   :  { %483 = vrot.lane.b32.xlu2 %v481_v53, %s875_s27 }
 0xa9c   :  { %v484_v56 = vpop.permute.xlu2 %483 }
 0xa9d   :  { %v486_v57 = vadd.f32 %v484_v56, %v476_v55 }
 0xa9f   :  { %791 = vtanh.f32 %v486_v57  ;;  %v543_v20 = vrot.slane %v486_v57, 6 }
 0xaa5   :  { %v792_v58 = vpop.eup %791 }
 0xaa6   :  { %489 = vrot.lane.b32.xlu0 %v792_v58, %s875_s27 }
 0xb18   :  { %v490_v59 = vpop.permute.xlu0 %489 }
 0xb19   :  { %v492_v60 = vmul.f32 %v490_v59, %v470_v52 }
 0xb1b   :  { %494 = vrot.lane.b32.xlu1 %v492_v60, %s876_s3 }
 0xb8d   :  { %v495_v61 = vpop.permute.xlu1 %494 }
 0xb8e   :  { %737 = vmatmul.msk.f32.vlgmr.msrb.gmra.mxu3 %vm155_vm7, %v495_v61 }
 0xc11   :  { %v515_v62 = vpop.f32.mrf.mxu3 }
 0xc12   :  { %v519_v63 = vrot.slane %v515_v62, 6 }
 0xc14   :  { %v521_v0 = vadd.f32 %v519_v63, %v983_v37 }
 0xc16   :  { %793 = vtanh.f32 %v521_v0  ;;  %v738_v3 = vmul.f32 -1.442695, %v521_v0 }
 0xc18   :  { %795 = vpow2.f32 %v738_v3 }
 0xc1c   :  { %v794_v1 = vpop.eup %793 }
 0xc1d   :  { %547 = vrot.lane.b32.xlu2 %v794_v1, %s875_s27 }
 0xc1e   :  { %v796_v30 = vpop.eup %795 }
 0xc1f   :  { %v525_v4 = vadd.f32 1.0, %v796_v30 }
 0xc21   :  { %797 = vrcp.f32 %v525_v4  ;;  %v537_v12 = vand.u32 2147483648, %v525_v4  ;;  %vm531_vm10 = vweird.f32 %v525_v4  ;;  %v535_v14 = vand.u32 2147483647, %v525_v4 }
 0xc23   :  { %v538_v16 = vor.u32 1.1754944e-38, %v537_v12  ;;  %vm536_vm12 = vcmp.eq.f32.partialorder %v535_v14, 8.507059e+37 }
 0xc27   :  { %v798_v5 = vpop.eup %797 }
 0xc28   :  { %v527_v6 = vmul.f32 %v798_v5, %v525_v4  ;;  %vm532_vm9 = vweird.f32 %v798_v5 }
 0xc29   :  { %vm533_vm11 = vmor %vm531_vm10, %vm532_vm9 }
 0xc2a   :  { %v528_v7 = vsub.f32 1.0, %v527_v6 }
 0xc2c   :  { %v529_v10 = vmul.f32 %v798_v5, %v528_v7 }
 0xc2e   :  { %v530_v11 = vadd.f32 %v798_v5, %v529_v10 }
 0xc30   :  { %v534_v15 = vsel %vm533_vm11, %v798_v5, %v530_v11 }
 0xc31   :  { %v539_v18 = vsel %vm536_vm12, %v538_v16, %v534_v15 }
 0xc32   :  { %v545_v21 = vmul.f32 %v543_v20, %v539_v18 }
 0xc77   :  { %v548_v17 = vpop.permute.xlu2 %547 }
 0xc78   :  { %v550_v19 = vmul.f32 %v548_v17, %v539_v18 }
 0xc7a   :  { %552 = vrot.lane.b32.xlu0 %v550_v19, %s875_s27 }
 0xcec   :  { %v553_v22 = vpop.permute.xlu0 %552 }
 0xced   :  { %v555_v23 = vadd.f32 %v553_v22, %v545_v21 }
 0xcef   :  { %799 = vtanh.f32 %v555_v23  ;;  %v613_v47 = vrot.slane %v555_v23, 6 }
 0xcf5   :  { %v800_v24 = vpop.eup %799 }
 0xcf6   :  { %558 = vrot.lane.b32.xlu1 %v800_v24, %s875_s27 }
 0xd68   :  { %v559_v25 = vpop.permute.xlu1 %558 }
 0xd69   :  { %v561_v26 = vmul.f32 %v559_v25, %v539_v18 }
 0xd6b   :  { %v563_v28 = vrot.slane %v561_v26, 2 }
 0xd6d   :  { %564 = vrot.lane.b32.xlu2 %v563_v28, %s876_s3 }
 0xdc7   :  { %v565_v29 = vpop.permute.xlu2 %564 }
 0xdc8   :  { %739 = vmatmul.msk.f32.vlgmr.msrb.gmra.mxu0 %vm155_vm7, %v565_v29 }
 0xe45   :  { %v585_v31 = vpop.f32.mrf.mxu0 }
 0xe46   :  { %v589_v8 = vrot.slane %v585_v31, 4 }
 0xe48   :  { %v591_v32 = vadd.f32 %v589_v8, %v983_v37 }
 0xe4a   :  { %801 = vtanh.f32 %v591_v32  ;;  %v740_v33 = vmul.f32 -1.442695, %v591_v32 }
 0xe4c   :  { %803 = vpow2.f32 %v740_v33 }
 0xe50   :  { %v802_v9 = vpop.eup %801 }
 0xe51   :  { %617 = vrot.lane.b32.xlu0 %v802_v9, %s875_s27 }
 0xe52   :  { %v804_v34 = vpop.eup %803 }
 0xe53   :  { %v595_v2 = vadd.f32 1.0, %v804_v34 }
 0xe55   :  { %805 = vrcp.f32 %v595_v2  ;;  %v607_v40 = vand.u32 2147483648, %v595_v2  ;;  %vm601_vm14 = vweird.f32 %v595_v2  ;;  %v605_v41 = vand.u32 2147483647, %v595_v2 }
 0xe57   :  { %v608_v43 = vor.u32 1.1754944e-38, %v607_v40  ;;  %vm606_vm0 = vcmp.eq.f32.partialorder %v605_v41, 8.507059e+37 }
 0xe5b   :  { %v806_v35 = vpop.eup %805 }
 0xe5c   :  { %v597_v36 = vmul.f32 %v806_v35, %v595_v2  ;;  %vm602_vm13 = vweird.f32 %v806_v35 }
 0xe5d   :  { %vm603_vm15 = vmor %vm601_vm14, %vm602_vm13 }
 0xe5e   :  { %v598_v13 = vsub.f32 1.0, %v597_v36 }
 0xe60   :  { %v599_v38 = vmul.f32 %v806_v35, %v598_v13 }
 0xe62   :  { %v600_v39 = vadd.f32 %v806_v35, %v599_v38 }
 0xe64   :  { %v604_v42 = vsel %vm603_vm15, %v806_v35, %v600_v39 }
 0xe65   :  { %v609_v45 = vsel %vm606_vm0, %v608_v43, %v604_v42 }
 0xe66   :  { %v615_v27 = vmul.f32 %v613_v47, %v609_v45 }
 0xec3   :  { %v618_v44 = vpop.permute.xlu0 %617 }
 0xec4   :  { %v620_v46 = vmul.f32 %v618_v44, %v609_v45 }
 0xec6   :  { %622 = vrot.lane.b32.xlu1 %v620_v46, %s875_s27 }
 0xf38   :  { %v623_v48 = vpop.permute.xlu1 %622 }
 0xf39   :  { %v625_v49 = vadd.f32 %v623_v48, %v615_v27 }
 0xf3b   :  { %807 = vtanh.f32 %v625_v49  ;;  %v683_v11 = vrot.slane %v625_v49, 6 }
 0xf41   :  { %v808_v50 = vpop.eup %807 }
 0xf42   :  { %628 = vrot.lane.b32.xlu2 %v808_v50, %s875_s27 }
 0xf9c   :  { %v629_v51 = vpop.permute.xlu2 %628 }
 0xf9d   :  { %v631_v52 = vmul.f32 %v629_v51, %v609_v45 }
 0xf9f   :  { %v633_v53 = vrot.slane %v631_v52, 4 }
 0xfa1   :  { %634 = vrot.lane.b32.xlu0 %v633_v53, %s876_s3 }
0x1013   :  { %v635_v54 = vpop.permute.xlu0 %634 }
0x1014   :  { %741 = vmatmul.msk.f32.vlgmr.msra.gmra.mxu1 %vm155_vm7, %v635_v54 }
0x1091   :  { %v655_v55 = vpop.f32.mrf.mxu1 }
0x1092   :  { %v659_v56 = vrot.slane %v655_v55, 2 }
0x1094   :  { %v661_v57 = vadd.f32 %v659_v56, %v983_v37 }
0x1096   :  { %809 = vtanh.f32 %v661_v57  ;;  %v742_v59 = vmul.f32 -1.442695, %v661_v57 }
0x1098   :  { %811 = vpow2.f32 %v742_v59 }
0x109c   :  { %v810_v58 = vpop.eup %809 }
0x109d   :  { %687 = vrot.lane.b32.xlu1 %v810_v58, %s875_s27 }
0x109e   :  { %v812_v60 = vpop.eup %811 }
0x109f   :  { %v665_v61 = vadd.f32 1.0, %v812_v60 }
0x10a1   :  { %813 = vrcp.f32 %v665_v61  ;;  %v677_v30 = vand.u32 2147483648, %v665_v61  ;;  %vm671_vm7 = vweird.f32 %v665_v61  ;;  %v675_v4 = vand.u32 2147483647, %v665_v61 }
0x10a3   :  { %v678_v5 = vor.u32 1.1754944e-38, %v677_v30  ;;  %vm676_vm5 = vcmp.eq.f32.partialorder %v675_v4, 8.507059e+37 }
0x10a7   :  { %v814_v62 = vpop.eup %813 }
0x10a8   :  { %v667_v63 = vmul.f32 %v814_v62, %v665_v61  ;;  %vm672_vm3 = vweird.f32 %v814_v62 }
0x10a9   :  { %vm673_vm4 = vmor %vm671_vm7, %vm672_vm3 }
0x10aa   :  { %v668_v0 = vsub.f32 1.0, %v667_v63 }
0x10ac   :  { %v669_v1 = vmul.f32 %v814_v62, %v668_v0 }
0x10ae   :  { %v670_v3 = vadd.f32 %v814_v62, %v669_v1 }
0x10b0   :  { %v674_v37 = vsel %vm673_vm4, %v814_v62, %v670_v3 }
0x10b1   :  { %v679_v7 = vsel %vm676_vm5, %v678_v5, %v674_v37 }
0x10b2   :  { %v685_v12 = vmul.f32 %v683_v11, %v679_v7 }
0x110f   :  { %v688_v6 = vpop.permute.xlu1 %687 }
0x1110   :  { %v690_v10 = vmul.f32 %v688_v6, %v679_v7 }
0x1112   :  { %692 = vrot.lane.b32.xlu2 %v690_v10, %s875_s27 }
0x116c   :  { %v693_v14 = vpop.permute.xlu2 %692 }
0x116d   :  { %v695_v15 = vadd.f32 %v693_v14, %v685_v12 }
0x116f   :  { %815 = vtanh.f32 %v695_v15 }
0x1175   :  { %v816_v16 = vpop.eup %815 }
0x1176   :  { %698 = vrot.lane.b32.xlu0 %v816_v16, %s875_s27 }
0x11e8   :  { %v699_v17 = vpop.permute.xlu0 %698 }
0x11e9   :  { %v701_v18 = vmul.f32 %v699_v17, %v679_v7 }
0x11eb   :  { %703 = vrot.lane.b32.xlu1 %v701_v18, %s876_s3 }
0x125d   :  { %v704_v19 = vpop.permute.xlu1 %703 }
0x125e   :  { %707 = vst.msk [vmem:[#allocation5 - $0x6] sm:$0xc0] %vm706_vm1, %v704_v19 }
0x125f   :  { %718 = dma.vmem_to_hbm [thread:$0]  %s714_s29, 32, %s716_s6, [#allocation4]  }
0x1260   :  { %867 = dma.done.wait [#allocation4], 32  }
0x1261   :  { %868 = vsyncadd [#allocation4], 4294967264 }
0x1262   :  { %723 = vsyncpa [#allocation3], 1 }
0x1263   :  { %724 = vsyncpa [#allocation4], 1 }

</bundles_post_ra>
